<compile_context>
chip_gen: v7x
topology: tpu7x:2x2x1
jax: 0.10.0
libtpu: 0.0.40
codegen_flags: <defaults>
</compile_context>

<pallas_src>
import math
import functools

import jax
import jax.numpy as jnp
from jax import lax
from jax.experimental import pallas as pl
from jax.experimental.pallas import tpu as pltpu


def _mha_kernel(xq_ref, xk_ref, xv_ref,
                wq_ref, bq_ref, wk_ref, bk_ref,
                wv_ref, bv_ref, wo_ref, bo_ref,
                out_ref, k_scr, v_scr, *, n_heads: int, d_k: int):
    # Tiles per grid step (b, i):
    #   xq:           (1, tq, D) bf16   query tile
    #   xk, xv:       (1, S,  D) bf16   full key/value length (block idx only
    #                                    changes with b -> DMA'd once per b)
    #   weights:      (D, D) bf16; biases: (1, D) f32
    #   out:          (1, tq, D) f32
    #   k_scr/v_scr:  VMEM (S, D) bf16  cached K/V projections for batch b
    # Cache the K/V projections once per batch element (i == 0).  Grid axis 1
    # is "arbitrary", so every core that processes batch b starts at i == 0.
    @pl.when(pl.program_id(1) == 0)
    def _():
        k = jnp.dot(xk_ref[0], wk_ref[...],
                    preferred_element_type=jnp.float32) + bk_ref[0]
        v = jnp.dot(xv_ref[0], wv_ref[...],
                    preferred_element_type=jnp.float32) + bv_ref[0]
        k_scr[...] = k.astype(k_scr.dtype)
        v_scr[...] = v.astype(v_scr.dtype)

    # Q projection for this query tile.  1/sqrt(d_k) is folded into wq/bq by
    # the wrapper.  bf16 operands, f32 accumulation; bias add in f32.
    q = jnp.dot(xq_ref[0], wq_ref[...],
                preferred_element_type=jnp.float32) + bq_ref[0]
    q = q.astype(jnp.bfloat16)                     # (tq, D) MXU operand

    k = k_scr[...]                                 # (S, D) bf16
    v = v_scr[...]                                 # (S, D) bf16
    wo = wo_ref[...]                               # (D, D) bf16

    # Contract the last axis of both operands (q_h @ k_h^T, no transpose).
    contract_last = (((1,), (1,)), ((), ()))

    tq = q.shape[0]
    d_model = wo.shape[1]
    # Lane-dense (tq, D) f32 accumulator: each head folds its contribution
    # through the matching rows of W_o, so no lane-masked scratch stores and
    # no slab readback are needed.
    out_acc = jnp.zeros((tq, d_model), jnp.float32)

    # Static loop over heads (n_heads is small).  TODO(synk): for long-S
    # configs convert to lax.fori_loop / a grid axis to bound live ranges.
    for h in range(n_heads):
        sl = slice(h * d_k, (h + 1) * d_k)
        q_h = q[:, sl]                             # (tq, d_k) bf16
        k_h = k[:, sl]                             # (S,  d_k) bf16
        v_h = v[:, sl]                             # (S,  d_k) bf16

        scores = lax.dot_general(q_h, k_h, contract_last,
                                 preferred_element_type=jnp.float32)  # (tq, S)
        # Softmax in f32 on the VPU; reciprocal on the EUP (approx ~1e-4 rel,
        # fine for inference — revisit if this feeds a backward pass).
        scores = scores - jnp.max(scores, axis=-1, keepdims=True)
        p = jnp.exp(scores)
        denom = jnp.sum(p, axis=-1, keepdims=True)
        probs = (p * pl.reciprocal(denom, approx=True)).astype(jnp.bfloat16)

        attn_h = jnp.dot(probs, v_h,
                         preferred_element_type=jnp.float32)          # (tq, d_k)
        out_acc = out_acc + jnp.dot(attn_h.astype(jnp.bfloat16), wo[sl, :],
                                    preferred_element_type=jnp.float32)

    out_ref[0] = (out_acc + bo_ref[0]).astype(out_ref.dtype)


def _vmem_capacity_bytes(default: int = 64 * 1024 * 1024) -> int:
    """Best-effort VMEM capacity query; conservative (v7x) fallback."""
    try:
        info = pltpu.get_tpu_info()
        cap = getattr(info, "vmem_capacity_bytes", None)
        if cap:
            return int(cap)
    except Exception:
        pass
    return default


def _pick_tq(S: int, q_block: int) -> int:
    """Largest multiple-of-8 divisor of S that is <= q_block (else full S)."""
    start = min(q_block, S)
    start -= start % 8
    for cand in range(start, 0, -8):
        if S % cand == 0:
            return cand
    return S


def multi_head_attention(xq, xk, xv, params, *, n_heads: int, q_block=None):
    """xq, xk, xv: (B, S, D) float32.  params: dict of f32 weights/biases."""
    B, S, D = xq.shape
    assert D % n_heads == 0, "d_model must be divisible by n_heads"
    d_k = D // n_heads
    scale = 1.0 / math.sqrt(d_k)
    out_dtype = xq.dtype

    bf16 = jnp.bfloat16
    # Fold the attention scale into the Q projection; bf16 MXU operands.
    wq = (params["wq"] * scale).astype(bf16)
    bq = (params["bq"] * scale).reshape(1, D).astype(jnp.float32)
    wk = params["wk"].astype(bf16)
    bk = params["bk"].reshape(1, D).astype(jnp.float32)
    wv = params["wv"].astype(bf16)
    bv = params["bv"].reshape(1, D).astype(jnp.float32)
    wo = params["wo"].astype(bf16)
    bo = params["bo"].reshape(1, D).astype(jnp.float32)
    xq_b = xq.astype(bf16)
    xk_b = xk.astype(bf16)
    xv_b = xv.astype(bf16)

    vmem_cap = _vmem_capacity_bytes()
    if q_block is None:
        # 128 MiB parts (v5e/v6e): tq=256 feeds the 256-wide MXU and halves
        # per-step overhead; 64 MiB parts (v7x): stay at 128 until flash-style
        # KV tiling lands.  (v5e would also be fine at 128; minor nit.)
        q_block = 256 if vmem_cap >= 96 * 1024 * 1024 else 128

    tq = _pick_tq(S, q_block)
    n_q = S // tq

    q_spec = pl.BlockSpec((1, tq, D), lambda b, i: (b, i, 0))
    kv_spec = pl.BlockSpec((1, S, D), lambda b, i: (b, 0, 0))
    w_spec = pl.BlockSpec((D, D), lambda b, i: (0, 0))
    b_spec = pl.BlockSpec((1, D), lambda b, i: (0, 0))
    out_spec = pl.BlockSpec((1, tq, D), lambda b, i: (b, i, 0))

    # VMEM budget from actual tile sizes (+ in-kernel working set + headroom),
    # clamped to this chip's capacity.
    BF, F32 = 2, 4
    io_vmem = (
        2 * tq * D * BF          # xq tile (double-buffered)
        + 2 * 2 * S * D * BF     # xk, xv tiles (double-buffered)
        + 2 * 4 * D * D * BF     # 4 weight matrices (double-buffered)
        + 2 * 4 * D * F32        # 4 biases
        + 2 * tq * D * F32       # output tile
        + 2 * S * D * BF         # cached K/V projection scratch
    )
    work_vmem = 3 * tq * S * F32 + 4 * tq * D * F32
    vmem_limit = max(io_vmem + work_vmem + (8 << 20), 16 << 20)
    vmem_limit = min(vmem_limit, vmem_cap - (4 << 20))

    # Advisory cost estimate (K/V projections counted once per batch element).
    flops = B * (8 * S * D * D + 4 * S * S * D)
    cost = pl.CostEstimate(
        flops=flops,
        transcendentals=B * n_heads * S * S,
        bytes_accessed=(3 * B * S * D * BF + 4 * D * D * BF + 4 * D * F32
                        + B * S * D * F32),
    )

    kernel = functools.partial(_mha_kernel, n_heads=n_heads, d_k=d_k)

    return pl.pallas_call(
        kernel,
        out_shape=jax.ShapeDtypeStruct((B, S, D), out_dtype),
        grid_spec=pltpu.PrefetchScalarGridSpec(
            num_scalar_prefetch=0,
            grid=(B, n_q),
            in_specs=[q_spec, kv_spec, kv_spec,
                      w_spec, b_spec, w_spec, b_spec,
                      w_spec, b_spec, w_spec, b_spec],
            out_specs=out_spec,
            scratch_shapes=[pltpu.VMEM((S, D), bf16),   # cached K projection
                            pltpu.VMEM((S, D), bf16)],  # cached V projection
        ),
        compiler_params=pltpu.CompilerParams(
            # Axis 1 MUST be "arbitrary": the K/V projection cache is written
            # at i == 0 and read at i > 0 within each batch element.
            dimension_semantics=("parallel", "arbitrary"),
            vmem_limit_bytes=int(vmem_limit),
        ),
        cost_estimate=cost,
    )(xq_b, xk_b, xv_b, wq, bq, wk, bk, wv, bv, wo, bo)


def _reference_mha(xq, xk, xv, params, *, n_heads: int):
    """Pure-JAX f32 reference mirroring the PyTorch forward (mask=None)."""
    B, S, D = xq.shape
    d_k = D // n_heads

    def lin(x, w, b):
        return x @ w + b

    def split(x):  # (B, S, D) -> (B, H, S, d_k)
        return x.reshape(B, S, n_heads, d_k).transpose(0, 2, 1, 3)

    q = split(lin(xq, params["wq"], params["bq"]))
    k = split(lin(xk, params["wk"], params["bk"]))
    v = split(lin(xv, params["wv"], params["bv"]))

    scores = jnp.einsum("bhqd,bhkd->bhqk", q, k) / math.sqrt(d_k)
    probs = jax.nn.softmax(scores, axis=-1)
    attn = jnp.einsum("bhqk,bhkd->bhqd", probs, v)
    attn = attn.transpose(0, 2, 1, 3).reshape(B, S, D)
    return lin(attn, params["wo"], params["bo"])


def init_params(key, d_model: int):
    """Deterministic init mimicking nn.Linear's U(-1/sqrt(fan_in), ...)."""
    bound = 1.0 / math.sqrt(d_model)
    keys = jax.random.split(key, 8)
    names = ["wq", "bq", "wk", "bk", "wv", "bv", "wo", "bo"]
    params = {}
    for i, name in enumerate(names):
        shape = (d_model, d_model) if name.startswith("w") else (d_model,)
        params[name] = jax.random.uniform(
            keys[i], shape, jnp.float32, minval=-bound, maxval=bound)
    return params


if __name__ == "__main__":
    B, S, D, H = 2, 8, 32, 4   # batch, seq, d_model, n_heads  (d_k = 8)

    root = jax.random.PRNGKey(0)
    kq, kk, kv, kp = jax.random.split(root, 4)
    xq = jax.random.normal(kq, (B, S, D), jnp.float32)
    xk = jax.random.normal(kk, (B, S, D), jnp.float32)
    xv = jax.random.normal(kv, (B, S, D), jnp.float32)
    params = init_params(kp, D)

    out = multi_head_attention(xq, xk, xv, params, n_heads=H)
    out = jax.block_until_ready(out)

    ref = _reference_mha(xq, xk, xv, params, n_heads=H)
    assert out.shape == (B, S, D)
    # Tolerance 3e-2: bf16 MXU operands (f32 accumulation) plus the approx EUP
    # reciprocal vs. the full-f32 reference; typical error here is ~5e-3.
    assert jnp.allclose(out, ref, atol=3e-2, rtol=3e-2), "mismatch vs reference"

    print("KERNEL_OK")
</pallas_src>

<mosaic_0001>
module attributes {stable_mosaic.version = 11 : i64} {
  func.func @_mha_kernel(%arg0: i32, %arg1: i32, %arg2: memref<1x8x32xbf16, #tpu.memory_space<vmem>>, %arg3: memref<1x8x32xbf16, #tpu.memory_space<vmem>>, %arg4: memref<1x8x32xbf16, #tpu.memory_space<vmem>>, %arg5: memref<32x32xbf16, #tpu.memory_space<vmem>>, %arg6: memref<1x32xf32, #tpu.memory_space<vmem>>, %arg7: memref<32x32xbf16, #tpu.memory_space<vmem>>, %arg8: memref<1x32xf32, #tpu.memory_space<vmem>>, %arg9: memref<32x32xbf16, #tpu.memory_space<vmem>>, %arg10: memref<1x32xf32, #tpu.memory_space<vmem>>, %arg11: memref<32x32xbf16, #tpu.memory_space<vmem>>, %arg12: memref<1x32xf32, #tpu.memory_space<vmem>>, %arg13: memref<1x8x32xf32, #tpu.memory_space<vmem>>, %arg14: memref<8x32xbf16, #tpu.memory_space<vmem>>, %arg15: memref<8x32xbf16, #tpu.memory_space<vmem>>) attributes {dimension_semantics = [#tpu.dimension_semantics<parallel>, #tpu.dimension_semantics<arbitrary>], iteration_bounds = array<i64: 2, 1>, scalar_prefetch = 0 : i64, scratch_operands = 2 : i64, tpu.core_type = #tpu.core_type<tc>, window_params = [{transform_indices = @transform_0, window_bounds = array<i64: 1, 8, 32>}, {transform_indices = @transform_1, window_bounds = array<i64: 1, 8, 32>}, {transform_indices = @transform_2, window_bounds = array<i64: 1, 8, 32>}, {pipeline_mode = #tpu.pipeline_mode<synchronous>, transform_indices = @transform_3, window_bounds = array<i64: 32, 32>}, {pipeline_mode = #tpu.pipeline_mode<synchronous>, transform_indices = @transform_4, window_bounds = array<i64: 1, 32>}, {pipeline_mode = #tpu.pipeline_mode<synchronous>, transform_indices = @transform_5, window_bounds = array<i64: 32, 32>}, {pipeline_mode = #tpu.pipeline_mode<synchronous>, transform_indices = @transform_6, window_bounds = array<i64: 1, 32>}, {pipeline_mode = #tpu.pipeline_mode<synchronous>, transform_indices = @transform_7, window_bounds = array<i64: 32, 32>}, {pipeline_mode = #tpu.pipeline_mode<synchronous>, transform_indices = @transform_8, window_bounds = array<i64: 1, 32>}, {pipeline_mode = #tpu.pipeline_mode<synchronous>, transform_indices = @transform_9, window_bounds = array<i64: 32, 32>}, {pipeline_mode = #tpu.pipeline_mode<synchronous>, transform_indices = @transform_10, window_bounds = array<i64: 1, 32>}, {transform_indices = @transform_11, window_bounds = array<i64: 1, 8, 32>}]} {
    %c0_i32 = arith.constant 0 : i32
    %0 = arith.cmpi eq, %arg1, %c0_i32 : i32
    %1 = arith.extui %0 : i1 to i32
    %c0_i32_0 = arith.constant 0 : i32
    %2 = arith.cmpi ne, %1, %c0_i32_0 : i32
    scf.if %2 {
      %c0_39 = arith.constant 0 : index
      %c0_40 = arith.constant 0 : index
      %c0_41 = arith.constant 0 : index
      %105 = vector.load %arg3[%c0_39, %c0_40, %c0_41] : memref<1x8x32xbf16, #tpu.memory_space<vmem>>, vector<1x8x32xbf16>
      %106 = vector.shape_cast %105 : vector<1x8x32xbf16> to vector<8x32xbf16>
      %c0_42 = arith.constant 0 : index
      %c0_43 = arith.constant 0 : index
      %107 = vector.load %arg7[%c0_42, %c0_43] : memref<32x32xbf16, #tpu.memory_space<vmem>>, vector<32x32xbf16>
      %cst_44 = arith.constant dense<0.000000e+00> : vector<8x32xf32>
      %108 = tpu.matmul %106, %107, %cst_44 {dimension_numbers = #tpu.dot_dimension_numbers<[1], [0], [0], [1], [0, 0, 1, 1], [], []>} : vector<8x32xbf16>, vector<32x32xbf16>, vector<8x32xf32> -> vector<8x32xf32>
      %c0_45 = arith.constant 0 : index
      %c0_46 = arith.constant 0 : index
      %109 = vector.load %arg8[%c0_45, %c0_46] : memref<1x32xf32, #tpu.memory_space<vmem>>, vector<1x32xf32>
      %110 = vector.shape_cast %109 : vector<1x32xf32> to vector<32xf32>
      %111 = vector.shape_cast %110 : vector<32xf32> to vector<1x32xf32>
      %112 = vector.broadcast %111 : vector<1x32xf32> to vector<8x32xf32>
      %113 = arith.addf %108, %112 : vector<8x32xf32>
      %c0_47 = arith.constant 0 : index
      %c0_48 = arith.constant 0 : index
      %c0_49 = arith.constant 0 : index
      %114 = vector.load %arg4[%c0_47, %c0_48, %c0_49] : memref<1x8x32xbf16, #tpu.memory_space<vmem>>, vector<1x8x32xbf16>
      %115 = vector.shape_cast %114 : vector<1x8x32xbf16> to vector<8x32xbf16>
      %c0_50 = arith.constant 0 : index
      %c0_51 = arith.constant 0 : index
      %116 = vector.load %arg9[%c0_50, %c0_51] : memref<32x32xbf16, #tpu.memory_space<vmem>>, vector<32x32xbf16>
      %cst_52 = arith.constant dense<0.000000e+00> : vector<8x32xf32>
      %117 = tpu.matmul %115, %116, %cst_52 {dimension_numbers = #tpu.dot_dimension_numbers<[1], [0], [0], [1], [0, 0, 1, 1], [], []>} : vector<8x32xbf16>, vector<32x32xbf16>, vector<8x32xf32> -> vector<8x32xf32>
      %c0_53 = arith.constant 0 : index
      %c0_54 = arith.constant 0 : index
      %118 = vector.load %arg10[%c0_53, %c0_54] : memref<1x32xf32, #tpu.memory_space<vmem>>, vector<1x32xf32>
      %119 = vector.shape_cast %118 : vector<1x32xf32> to vector<32xf32>
      %120 = vector.shape_cast %119 : vector<32xf32> to vector<1x32xf32>
      %121 = vector.broadcast %120 : vector<1x32xf32> to vector<8x32xf32>
      %122 = arith.addf %117, %121 : vector<8x32xf32>
      %123 = arith.truncf %113 : vector<8x32xf32> to vector<8x32xbf16>
      %c0_55 = arith.constant 0 : index
      %c0_56 = arith.constant 0 : index
      %124 = vector.load %arg14[%c0_55, %c0_56] : memref<8x32xbf16, #tpu.memory_space<vmem>>, vector<8x32xbf16>
      tpu.vector_store %arg14[%c0_55, %c0_56], %123 {strides = array<i32>} : memref<8x32xbf16, #tpu.memory_space<vmem>>, vector<8x32xbf16>,
      %125 = arith.truncf %122 : vector<8x32xf32> to vector<8x32xbf16>
      %c0_57 = arith.constant 0 : index
      %c0_58 = arith.constant 0 : index
      %126 = vector.load %arg15[%c0_57, %c0_58] : memref<8x32xbf16, #tpu.memory_space<vmem>>, vector<8x32xbf16>
      tpu.vector_store %arg15[%c0_57, %c0_58], %125 {strides = array<i32>} : memref<8x32xbf16, #tpu.memory_space<vmem>>, vector<8x32xbf16>,
    } else {
    }
    %c0 = arith.constant 0 : index
    %c0_1 = arith.constant 0 : index
    %c0_2 = arith.constant 0 : index
    %3 = vector.load %arg2[%c0, %c0_1, %c0_2] : memref<1x8x32xbf16, #tpu.memory_space<vmem>>, vector<1x8x32xbf16>
    %4 = vector.shape_cast %3 : vector<1x8x32xbf16> to vector<8x32xbf16>
    %c0_3 = arith.constant 0 : index
    %c0_4 = arith.constant 0 : index
    %5 = vector.load %arg5[%c0_3, %c0_4] : memref<32x32xbf16, #tpu.memory_space<vmem>>, vector<32x32xbf16>
    %cst = arith.constant dense<0.000000e+00> : vector<8x32xf32>
    %6 = tpu.matmul %4, %5, %cst {dimension_numbers = #tpu.dot_dimension_numbers<[1], [0], [0], [1], [0, 0, 1, 1], [], []>} : vector<8x32xbf16>, vector<32x32xbf16>, vector<8x32xf32> -> vector<8x32xf32>
    %c0_5 = arith.constant 0 : index
    %c0_6 = arith.constant 0 : index
    %7 = vector.load %arg6[%c0_5, %c0_6] : memref<1x32xf32, #tpu.memory_space<vmem>>, vector<1x32xf32>
    %8 = vector.shape_cast %7 : vector<1x32xf32> to vector<32xf32>
    %9 = vector.shape_cast %8 : vector<32xf32> to vector<1x32xf32>
    %10 = vector.broadcast %9 : vector<1x32xf32> to vector<8x32xf32>
    %11 = arith.addf %6, %10 : vector<8x32xf32>
    %12 = arith.truncf %11 : vector<8x32xf32> to vector<8x32xbf16>
    %c0_7 = arith.constant 0 : index
    %c0_8 = arith.constant 0 : index
    %13 = vector.load %arg14[%c0_7, %c0_8] : memref<8x32xbf16, #tpu.memory_space<vmem>>, vector<8x32xbf16>
    %c0_9 = arith.constant 0 : index
    %c0_10 = arith.constant 0 : index
    %14 = vector.load %arg15[%c0_9, %c0_10] : memref<8x32xbf16, #tpu.memory_space<vmem>>, vector<8x32xbf16>
    %c0_11 = arith.constant 0 : index
    %c0_12 = arith.constant 0 : index
    %15 = vector.load %arg11[%c0_11, %c0_12] : memref<32x32xbf16, #tpu.memory_space<vmem>>, vector<32x32xbf16>
    %cst_13 = arith.constant 0.000000e+00 : f32
    %16 = vector.broadcast %cst_13 : f32 to vector<8x32xf32>
    %17 = vector.extract_strided_slice %12 {offsets = [0, 0], sizes = [8, 8], strides = [1, 1]} : vector<8x32xbf16> to vector<8x8xbf16>
    %18 = vector.extract_strided_slice %13 {offsets = [0, 0], sizes = [8, 8], strides = [1, 1]} : vector<8x32xbf16> to vector<8x8xbf16>
    %19 = vector.extract_strided_slice %14 {offsets = [0, 0], sizes = [8, 8], strides = [1, 1]} : vector<8x32xbf16> to vector<8x8xbf16>
    %cst_14 = arith.constant dense<0.000000e+00> : vector<8x8xf32>
    %20 = tpu.matmul %17, %18, %cst_14 {dimension_numbers = #tpu.dot_dimension_numbers<[1], [1], [0], [0], [0, 0, 1, 0], [], []>} : vector<8x8xbf16>, vector<8x8xbf16>, vector<8x8xf32> -> vector<8x8xf32>
    %cst_15 = arith.constant dense<0xFF800000> : vector<8xf32>
    %21 = vector.multi_reduction <maximumf>, %20, %cst_15 [1] : vector<8x8xf32> to vector<8xf32>
    %22 = vector.shape_cast %21 : vector<8xf32> to vector<8x1xf32>
    %23 = vector.broadcast %22 : vector<8x1xf32> to vector<8x8xf32>
    %24 = arith.subf %20, %23 : vector<8x8xf32>
    %25 = math.exp %24 : vector<8x8xf32>
    %cst_16 = arith.constant dense<0.000000e+00> : vector<8xf32>
    %26 = vector.multi_reduction <add>, %25, %cst_16 [1] : vector<8x8xf32> to vector<8xf32>
    %27 = vector.shape_cast %26 : vector<8xf32> to vector<8x1xf32>
    %28 = tpu.reciprocal %27 {approx = true} : vector<8x1xf32> -> vector<8x1xf32>
    %29 = vector.broadcast %28 : vector<8x1xf32> to vector<8x8xf32>
    %30 = arith.mulf %25, %29 : vector<8x8xf32>
    %31 = arith.truncf %30 : vector<8x8xf32> to vector<8x8xbf16>
    %cst_17 = arith.constant dense<0.000000e+00> : vector<8x8xf32>
    %32 = tpu.matmul %31, %19, %cst_17 {dimension_numbers = #tpu.dot_dimension_numbers<[1], [0], [0], [1], [0, 0, 1, 1], [], []>} : vector<8x8xbf16>, vector<8x8xbf16>, vector<8x8xf32> -> vector<8x8xf32>
    %33 = arith.truncf %32 : vector<8x8xf32> to vector<8x8xbf16>
    %34 = vector.extract_strided_slice %15 {offsets = [0, 0], sizes = [8, 32], strides = [1, 1]} : vector<32x32xbf16> to vector<8x32xbf16>
    %cst_18 = arith.constant dense<0.000000e+00> : vector<8x32xf32>
    %35 = tpu.matmul %33, %34, %cst_18 {dimension_numbers = #tpu.dot_dimension_numbers<[1], [0], [0], [1], [0, 0, 1, 1], [], []>} : vector<8x8xbf16>, vector<8x32xbf16>, vector<8x32xf32> -> vector<8x32xf32>
    %36 = arith.addf %16, %35 : vector<8x32xf32>
    %37 = vector.extract_strided_slice %12 {offsets = [0, 8], sizes = [8, 8], strides = [1, 1]} : vector<8x32xbf16> to vector<8x8xbf16>
    %38 = vector.extract_strided_slice %13 {offsets = [0, 8], sizes = [8, 8], strides = [1, 1]} : vector<8x32xbf16> to vector<8x8xbf16>
    %39 = vector.extract_strided_slice %14 {offsets = [0, 8], sizes = [8, 8], strides = [1, 1]} : vector<8x32xbf16> to vector<8x8xbf16>
    %cst_19 = arith.constant dense<0.000000e+00> : vector<8x8xf32>
    %40 = tpu.matmul %37, %38, %cst_19 {dimension_numbers = #tpu.dot_dimension_numbers<[1], [1], [0], [0], [0, 0, 1, 0], [], []>} : vector<8x8xbf16>, vector<8x8xbf16>, vector<8x8xf32> -> vector<8x8xf32>
    %cst_20 = arith.constant dense<0xFF800000> : vector<8xf32>
    %41 = vector.multi_reduction <maximumf>, %40, %cst_20 [1] : vector<8x8xf32> to vector<8xf32>
    %42 = vector.shape_cast %41 : vector<8xf32> to vector<8x1xf32>
    %43 = vector.broadcast %42 : vector<8x1xf32> to vector<8x8xf32>
    %44 = arith.subf %40, %43 : vector<8x8xf32>
    %45 = math.exp %44 : vector<8x8xf32>
    %cst_21 = arith.constant dense<0.000000e+00> : vector<8xf32>
    %46 = vector.multi_reduction <add>, %45, %cst_21 [1] : vector<8x8xf32> to vector<8xf32>
    %47 = vector.shape_cast %46 : vector<8xf32> to vector<8x1xf32>
    %48 = tpu.reciprocal %47 {approx = true} : vector<8x1xf32> -> vector<8x1xf32>
    %49 = vector.broadcast %48 : vector<8x1xf32> to vector<8x8xf32>
    %50 = arith.mulf %45, %49 : vector<8x8xf32>
    %51 = arith.truncf %50 : vector<8x8xf32> to vector<8x8xbf16>
    %cst_22 = arith.constant dense<0.000000e+00> : vector<8x8xf32>
    %52 = tpu.matmul %51, %39, %cst_22 {dimension_numbers = #tpu.dot_dimension_numbers<[1], [0], [0], [1], [0, 0, 1, 1], [], []>} : vector<8x8xbf16>, vector<8x8xbf16>, vector<8x8xf32> -> vector<8x8xf32>
    %53 = arith.truncf %52 : vector<8x8xf32> to vector<8x8xbf16>
    %54 = vector.extract_strided_slice %15 {offsets = [8, 0], sizes = [8, 32], strides = [1, 1]} : vector<32x32xbf16> to vector<8x32xbf16>
    %cst_23 = arith.constant dense<0.000000e+00> : vector<8x32xf32>
    %55 = tpu.matmul %53, %54, %cst_23 {dimension_numbers = #tpu.dot_dimension_numbers<[1], [0], [0], [1], [0, 0, 1, 1], [], []>} : vector<8x8xbf16>, vector<8x32xbf16>, vector<8x32xf32> -> vector<8x32xf32>
    %56 = arith.addf %36, %55 : vector<8x32xf32>
    %57 = vector.extract_strided_slice %12 {offsets = [0, 16], sizes = [8, 8], strides = [1, 1]} : vector<8x32xbf16> to vector<8x8xbf16>
    %58 = vector.extract_strided_slice %13 {offsets = [0, 16], sizes = [8, 8], strides = [1, 1]} : vector<8x32xbf16> to vector<8x8xbf16>
    %59 = vector.extract_strided_slice %14 {offsets = [0, 16], sizes = [8, 8], strides = [1, 1]} : vector<8x32xbf16> to vector<8x8xbf16>
    %cst_24 = arith.constant dense<0.000000e+00> : vector<8x8xf32>
    %60 = tpu.matmul %57, %58, %cst_24 {dimension_numbers = #tpu.dot_dimension_numbers<[1], [1], [0], [0], [0, 0, 1, 0], [], []>} : vector<8x8xbf16>, vector<8x8xbf16>, vector<8x8xf32> -> vector<8x8xf32>
    %cst_25 = arith.constant dense<0xFF800000> : vector<8xf32>
    %61 = vector.multi_reduction <maximumf>, %60, %cst_25 [1] : vector<8x8xf32> to vector<8xf32>
    %62 = vector.shape_cast %61 : vector<8xf32> to vector<8x1xf32>
    %63 = vector.broadcast %62 : vector<8x1xf32> to vector<8x8xf32>
    %64 = arith.subf %60, %63 : vector<8x8xf32>
    %65 = math.exp %64 : vector<8x8xf32>
    %cst_26 = arith.constant dense<0.000000e+00> : vector<8xf32>
    %66 = vector.multi_reduction <add>, %65, %cst_26 [1] : vector<8x8xf32> to vector<8xf32>
    %67 = vector.shape_cast %66 : vector<8xf32> to vector<8x1xf32>
    %68 = tpu.reciprocal %67 {approx = true} : vector<8x1xf32> -> vector<8x1xf32>
    %69 = vector.broadcast %68 : vector<8x1xf32> to vector<8x8xf32>
    %70 = arith.mulf %65, %69 : vector<8x8xf32>
    %71 = arith.truncf %70 : vector<8x8xf32> to vector<8x8xbf16>
    %cst_27 = arith.constant dense<0.000000e+00> : vector<8x8xf32>
    %72 = tpu.matmul %71, %59, %cst_27 {dimension_numbers = #tpu.dot_dimension_numbers<[1], [0], [0], [1], [0, 0, 1, 1], [], []>} : vector<8x8xbf16>, vector<8x8xbf16>, vector<8x8xf32> -> vector<8x8xf32>
    %73 = arith.truncf %72 : vector<8x8xf32> to vector<8x8xbf16>
    %74 = vector.extract_strided_slice %15 {offsets = [16, 0], sizes = [8, 32], strides = [1, 1]} : vector<32x32xbf16> to vector<8x32xbf16>
    %cst_28 = arith.constant dense<0.000000e+00> : vector<8x32xf32>
    %75 = tpu.matmul %73, %74, %cst_28 {dimension_numbers = #tpu.dot_dimension_numbers<[1], [0], [0], [1], [0, 0, 1, 1], [], []>} : vector<8x8xbf16>, vector<8x32xbf16>, vector<8x32xf32> -> vector<8x32xf32>
    %76 = arith.addf %56, %75 : vector<8x32xf32>
    %77 = vector.extract_strided_slice %12 {offsets = [0, 24], sizes = [8, 8], strides = [1, 1]} : vector<8x32xbf16> to vector<8x8xbf16>
    %78 = vector.extract_strided_slice %13 {offsets = [0, 24], sizes = [8, 8], strides = [1, 1]} : vector<8x32xbf16> to vector<8x8xbf16>
    %79 = vector.extract_strided_slice %14 {offsets = [0, 24], sizes = [8, 8], strides = [1, 1]} : vector<8x32xbf16> to vector<8x8xbf16>
    %cst_29 = arith.constant dense<0.000000e+00> : vector<8x8xf32>
    %80 = tpu.matmul %77, %78, %cst_29 {dimension_numbers = #tpu.dot_dimension_numbers<[1], [1], [0], [0], [0, 0, 1, 0], [], []>} : vector<8x8xbf16>, vector<8x8xbf16>, vector<8x8xf32> -> vector<8x8xf32>
    %cst_30 = arith.constant dense<0xFF800000> : vector<8xf32>
    %81 = vector.multi_reduction <maximumf>, %80, %cst_30 [1] : vector<8x8xf32> to vector<8xf32>
    %82 = vector.shape_cast %81 : vector<8xf32> to vector<8x1xf32>
    %83 = vector.broadcast %82 : vector<8x1xf32> to vector<8x8xf32>
    %84 = arith.subf %80, %83 : vector<8x8xf32>
    %85 = math.exp %84 : vector<8x8xf32>
    %cst_31 = arith.constant dense<0.000000e+00> : vector<8xf32>
    %86 = vector.multi_reduction <add>, %85, %cst_31 [1] : vector<8x8xf32> to vector<8xf32>
    %87 = vector.shape_cast %86 : vector<8xf32> to vector<8x1xf32>
    %88 = tpu.reciprocal %87 {approx = true} : vector<8x1xf32> -> vector<8x1xf32>
    %89 = vector.broadcast %88 : vector<8x1xf32> to vector<8x8xf32>
    %90 = arith.mulf %85, %89 : vector<8x8xf32>
    %91 = arith.truncf %90 : vector<8x8xf32> to vector<8x8xbf16>
    %cst_32 = arith.constant dense<0.000000e+00> : vector<8x8xf32>
    %92 = tpu.matmul %91, %79, %cst_32 {dimension_numbers = #tpu.dot_dimension_numbers<[1], [0], [0], [1], [0, 0, 1, 1], [], []>} : vector<8x8xbf16>, vector<8x8xbf16>, vector<8x8xf32> -> vector<8x8xf32>
    %93 = arith.truncf %92 : vector<8x8xf32> to vector<8x8xbf16>
    %94 = vector.extract_strided_slice %15 {offsets = [24, 0], sizes = [8, 32], strides = [1, 1]} : vector<32x32xbf16> to vector<8x32xbf16>
    %cst_33 = arith.constant dense<0.000000e+00> : vector<8x32xf32>
    %95 = tpu.matmul %93, %94, %cst_33 {dimension_numbers = #tpu.dot_dimension_numbers<[1], [0], [0], [1], [0, 0, 1, 1], [], []>} : vector<8x8xbf16>, vector<8x32xbf16>, vector<8x32xf32> -> vector<8x32xf32>
    %96 = arith.addf %76, %95 : vector<8x32xf32>
    %c0_34 = arith.constant 0 : index
    %c0_35 = arith.constant 0 : index
    %97 = vector.load %arg12[%c0_34, %c0_35] : memref<1x32xf32, #tpu.memory_space<vmem>>, vector<1x32xf32>
    %98 = vector.shape_cast %97 : vector<1x32xf32> to vector<32xf32>
    %99 = vector.shape_cast %98 : vector<32xf32> to vector<1x32xf32>
    %100 = vector.broadcast %99 : vector<1x32xf32> to vector<8x32xf32>
    %101 = arith.addf %96, %100 : vector<8x32xf32>
    %c0_36 = arith.constant 0 : index
    %c0_37 = arith.constant 0 : index
    %c0_38 = arith.constant 0 : index
    %102 = vector.load %arg13[%c0_36, %c0_37, %c0_38] : memref<1x8x32xf32, #tpu.memory_space<vmem>>, vector<1x8x32xf32>
    %103 = vector.shape_cast %102 : vector<1x8x32xf32> to vector<8x32xf32>
    %104 = vector.shape_cast %101 : vector<8x32xf32> to vector<1x8x32xf32>
    tpu.vector_store %arg13[%c0_36, %c0_37, %c0_38], %104 {strides = array<i32>} : memref<1x8x32xf32, #tpu.memory_space<vmem>>, vector<1x8x32xf32>,
    return
  }
  func.func @transform_0(%arg0: i32, %arg1: i32) -> (i32, i32, i32) {
    %c0_i32 = arith.constant 0 : i32
    %c0_i32_0 = arith.constant 0 : i32
    return %arg0, %arg1, %c0_i32 : i32, i32, i32
  }
  func.func @transform_1(%arg0: i32, %arg1: i32) -> (i32, i32, i32) {
    %c0_i32 = arith.constant 0 : i32
    %c0_i32_0 = arith.constant 0 : i32
    %c0_i32_1 = arith.constant 0 : i32
    return %arg0, %c0_i32, %c0_i32_0 : i32, i32, i32
  }
  func.func @transform_2(%arg0: i32, %arg1: i32) -> (i32, i32, i32) {
    %c0_i32 = arith.constant 0 : i32
    %c0_i32_0 = arith.constant 0 : i32
    %c0_i32_1 = arith.constant 0 : i32
    return %arg0, %c0_i32, %c0_i32_0 : i32, i32, i32
  }
  func.func @transform_3(%arg0: i32, %arg1: i32) -> (i32, i32) {
    %c0_i32 = arith.constant 0 : i32
    %c0_i32_0 = arith.constant 0 : i32
    %c0_i32_1 = arith.constant 0 : i32
    return %c0_i32, %c0_i32_0 : i32, i32
  }
  func.func @transform_4(%arg0: i32, %arg1: i32) -> (i32, i32) {
    %c0_i32 = arith.constant 0 : i32
    %c0_i32_0 = arith.constant 0 : i32
    %c0_i32_1 = arith.constant 0 : i32
    return %c0_i32, %c0_i32_0 : i32, i32
  }
  func.func @transform_5(%arg0: i32, %arg1: i32) -> (i32, i32) {
    %c0_i32 = arith.constant 0 : i32
    %c0_i32_0 = arith.constant 0 : i32
    %c0_i32_1 = arith.constant 0 : i32
    return %c0_i32, %c0_i32_0 : i32, i32
  }
  func.func @transform_6(%arg0: i32, %arg1: i32) -> (i32, i32) {
    %c0_i32 = arith.constant 0 : i32
    %c0_i32_0 = arith.constant 0 : i32
    %c0_i32_1 = arith.constant 0 : i32
    return %c0_i32, %c0_i32_0 : i32, i32
  }
  func.func @transform_7(%arg0: i32, %arg1: i32) -> (i32, i32) {
    %c0_i32 = arith.constant 0 : i32
    %c0_i32_0 = arith.constant 0 : i32
    %c0_i32_1 = arith.constant 0 : i32
    return %c0_i32, %c0_i32_0 : i32, i32
  }
  func.func @transform_8(%arg0: i32, %arg1: i32) -> (i32, i32) {
    %c0_i32 = arith.constant 0 : i32
    %c0_i32_0 = arith.constant 0 : i32
    %c0_i32_1 = arith.constant 0 : i32
    return %c0_i32, %c0_i32_0 : i32, i32
  }
  func.func @transform_9(%arg0: i32, %arg1: i32) -> (i32, i32) {
    %c0_i32 = arith.constant 0 : i32
    %c0_i32_0 = arith.constant 0 : i32
    %c0_i32_1 = arith.constant 0 : i32
    return %c0_i32, %c0_i32_0 : i32, i32
  }
  func.func @transform_10(%arg0: i32, %arg1: i32) -> (i32, i32) {
    %c0_i32 = arith.constant 0 : i32
    %c0_i32_0 = arith.constant 0 : i32
    %c0_i32_1 = arith.constant 0 : i32
    return %c0_i32, %c0_i32_0 : i32, i32
  }
  func.func @transform_11(%arg0: i32, %arg1: i32) -> (i32, i32, i32) {
    %c0_i32 = arith.constant 0 : i32
    %c0_i32_0 = arith.constant 0 : i32
    return %arg0, %arg1, %c0_i32 : i32, i32, i32
  }
}

</mosaic_0001>

<bundles_post_ra>
// kernel: tpu_custom_call.1
= control target key start
LH: loop header
LB: loop body
LE: loop exit
PB: predicated region body
PF: predicated region fallthrough
CT: control target
= control target key end

     0   :  { %s2699_s0 = inlined_call_operand.hbm [shape: bf16[2,8,32], index: 0, kind: input, shape index: {}]   ;;  %s2700_s1 = inlined_call_operand.hbm [shape: bf16[2,8,32], index: 1, kind: input, shape index: {}]   ;;  %s2701_s2 = inlined_call_operand.hbm [shape: bf16[2,8,32], index: 2, kind: input, shape index: {}]   ;;  %s2702_s3 = inlined_call_operand.hbm [shape: bf16[32,32], index: 3, kind: input, shape index: {}]   ;;  %s2703_s4 = inlined_call_operand.vmem [shape: f32[1,32], index: 4, kind: input, shape index: {}]   ;;  %s2704_s5 = inlined_call_operand.vmem [shape: bf16[32,32], index: 5, kind: input, shape index: {}]   ;;  %s2705_s6 = inlined_call_operand.vmem [shape: f32[1,32], index: 6, kind: input, shape index: {}]   ;;  %s2706_s7 = inlined_call_operand.hbm [shape: bf16[32,32], index: 7, kind: input, shape index: {}]   ;;  %s2707_s8 = inlined_call_operand.hbm [shape: f32[1,32], index: 8, kind: input, shape index: {}]   ;;  %s2708_s9 = inlined_call_operand.vmem [shape: bf16[32,32], index: 9, kind: input, shape index: {}]   ;;  %s2709_s10 = inlined_call_operand.vmem [shape: f32[1,32], index: 10, kind: input, shape index: {}]   ;;  %s2710_s11 = inlined_call_operand.hbm [shape: f32[2,8,32], index: 11, kind: output, shape index: {}]  }
   0x1   :  { %2736 = sst [smem:[#allocation29_spill]] %s2700_s1 }
   0x2   :  { %2737 = sst [smem:[#allocation30_spill]] %s2702_s3 }
   0x3   :  { %2738 = sst [smem:[#allocation31_spill]] %s2703_s4 }
   0x4   :  { %2739 = sst [smem:[#allocation32_spill]] %s2705_s6 }
   0x5   :  { %2740 = sst [smem:[#allocation33_spill]] %s2708_s9 }
   0x6   :  { %2741 = sst [smem:[#allocation34_spill]] %s2709_s10 }
   0x7   :  { %2742 = sst [smem:[#allocation35_spill]] %s2710_s11 }
   0x8   :  { %16 = vsyncpa [#allocation5], 0 }
   0x9   :  { %18 = vsyncpa [#allocation5 + $0x1], 0 }
   0xa   :  { %19 = vsyncpa [#allocation8], 0 }
   0xb   :  { %21 = vsyncpa [#allocation8 + $0x1], 0 }
   0xc   :  { %22 = vsyncpa [#allocation11], 0 }
   0xd   :  { %23 = vsyncpa [#allocation14], 0 }
   0xe   :  { %24 = vsyncpa [#allocation6], 0 }
   0xf   :  { %26 = vsyncpa [#allocation6 + $0x1], 0  ;;  %s2220_s17 = smov 0   ;;  %s2222_s18 = smov 0  }
  0x10   :  { %s2224_s19 = smov 0   ;;  %s2226_s20 = smov 0  }
  0x11   :  { %s2228_s21 = smov 0   ;;  %s2230_s22 = smov 0  }
  0x12 LB: > { %2743 = sst [smem:[#allocation21_spill]] %s2124_s17  ;;  %s2251_s23 = sadd.s32 4294967295, %s2144_s22   ;;  %s2144_s22 = sphi %s2230_s22, %s32_s22   ;;  %s2140_s21 = sphi %s2228_s21, %s2791_s21   ;;  %s2136_s20 = sphi %s2226_s20, %s2790_s20   ;;  %s2132_s19 = sphi %s2224_s19, %s2794_s19   ;;  %s2128_s18 = sphi %s2222_s18, %s2793_s18   ;;  %s2124_s17 = sphi %s2220_s17, %s2792_s17  }
  0x13   : > { %2744 = sst [smem:[#allocation22_spill]] %s2136_s20  ;;  %s1562_s24 = sadd.s32 4294967294, %s2144_s22  }
  0x14   : > { %2745 = sst [smem:[#allocation23_spill]] %s2140_s21  ;;  %p66_p0 = scmp.ne.s32.totalorder %s2128_s18, %s2124_s17 }
  0x15   : > { %2746 = sst [smem:[#allocation24_spill]] %s2144_s22  ;;  %p2713_p1 = scmp.eq.s32.totalorder %s2251_s23, 0 }
  0x16   : > { %p318_p3 = scmp.eq.s32.totalorder %s1562_s24, 1  ;;  %p1563_p5 = scmp.ge.s32.totalorder %s2144_s22, 1 }
  0x17   : > { %p2260_p4 = por %p2713_p1, %p66_p0  ;;  %p325_p7 = scmp.lt.s32.totalorder %s2144_s22, 3 }
  0x18   : > { %p2265_p6 = por %p318_p3, %p66_p0  ;;  %s2146_s28 = smov [#allocation10]  }
  0x19   : > { %s2747_s25 = scalar_select %p2260_p4, 1, 0 }
  0x1a   : > { %s2748_s26 = scalar_select %p2265_p6, 1, 0 }
  0x1b   : > { %p2270_p8 = pnand %p1563_p5, %p325_p7  ;;  %s337_s29 = sshll.u32 %s2146_s28, 4  ;;  %s338_s29 = int_to_ptr.vmem [resolvable:$true] %s337_s29 }
  0x1c   : > { %2749 = sst [smem:[#allocation25_spill]] %s2748_s26  ;;  %s44_s12 = sadd.s32 1, %s2140_s21 }
  0x1d   : > { %s2750_s27 = scalar_select %p2270_p8, 1, 0 }
  0x1e   : > { %p1762_p9 = pneg %p2270_p8  ;;  %s2752_s3 = sld [smem:[#allocation30_spill]] }
  0x20   : > { %p2279_p11 = pnand %p1762_p9, %p2713_p1 }
  0x22   : > { %s2751_s30 = scalar_select %p2279_p11, 1, 0 }
  0x23   : > { %p2292_p13 = pneg %p2279_p11 }
  0x24   : > { %s1876_s15 = scalar_lea.hbm %s2752_s3, 256 }
  0x25   : > { %p1877_p12 = scmp.ne.s32.totalorder %s2752_s3, %s1876_s15  ;;  %p1883_p5 = scmp.lt.u32.totalorder %s1876_s15, %s2752_s3 }
  0x26   : > { %s2753_s28 = scalar_select %p2292_p13, 1, 0 }
  0x27   : > { %p1879_p0 = pnand %p2292_p13, %p1877_p12 }
  0x29   : > { %p1880_p3 = pneg %p1879_p0 }
  0x2b   : > { %p1885_p7 = pnand %p1883_p5, %p1880_p3 }
  0x2d   : > { %1888 = shalt.err (!%p1885_p7)
}
  0x2e   : > { %s1889_s13 = scalar_lea.vmem %s338_s29, 256  ;;  %p1897_p2 = scmp.lt.s32.totalorder %s338_s29, %s338_s29 }
  0x2f   : > { %p1890_p9 = scmp.ne.s32.totalorder %s338_s29, %s1889_s13  ;;  %p1898_p6 = scmp.lt.s32.totalorder %s1889_s13, %s1889_s13 }
  0x31   : > { %p1892_p10 = pnand %p1890_p9, %p2292_p13  ;;  %p1899_p4 = por %p1898_p6, %p1897_p2 }
  0x33   : > { %p1893_p1 = pneg %p1892_p10 }
  0x35   : > { %p1900_p8 = pnand %p1899_p4, %p1893_p1 }
  0x37   : > { %1903 = shalt.err (!%p1900_p8)
}
  0x38   : > { %s2717_s14 = smov 64   ;;  %s2718_s17 = smov 4  }
  0x39   : > { %1765 = dma.hbm_to_vmem [thread:$0]  (!%p2279_p11), %s2752_s3, 256, %s338_s29, [#allocation11], %s2717_s14, %s2717_s14, %s2718_s17  }
  0x3a   : > { %p46_p1 = scmp.ge.s32.totalorder %s44_s12, 2  ;;  %s53_s16 = sadd.s32 1, %s2132_s19 }
  0x3b   : > { %p60_p2 = scmp.ne.s32.totalorder %s2132_s19, %s2128_s18  ;;  %p61_p4 = scmp.eq.s32.totalorder %s2144_s22, 0 }
  0x3c   : > { %s2796_s12 = smov (%p46_p1, %s44_s12), 0  ;;  %p2755_p8 = scmp.eq.s32.totalorder %s2251_s23, 1 }
  0x3d   : > { %2754 = sst [smem:[#allocation26_spill]] %s2796_s12  ;;  %p62_p6 = por %p61_p4, %p60_p2 }
  0x3e   : > { %p2319_p10 = por %p2755_p8, %p60_p2  ;;  %s48_s13 = ssub.s32 %s2140_s21, %s2796_s12 }
  0x3f   : > { %p1789_p12 = scmp.lt.s32.totalorder %s2144_s22, 2  ;;  %p51_p0 = scmp.eq.s32.totalorder %s48_s13, 0 }
  0x40   : > { %s2756_s24 = scalar_select %p2319_p10, 1, 0 }
  0x41   : > { %s2720_s11 = sand.u32 1, %s2132_s19   ;;  %s2332_s26 = sshll.u32 %s2140_s21, 6 }
  0x42   : > { %2757 = sst [smem:[#allocation27_spill]] %s2756_s24  ;;  %s2329_s29 = sshll.u32 %s2720_s11, 2 }
  0x43   : > { %s2335_s15 = scalar_select %p51_p0, %s2132_s19, %s53_s16  }
  0x44   : > { %p2337_p3 = pnand %p1789_p12, %p62_p6  ;;  %s409_s17 = sand.u32 1, %s2144_s22  }
  0x45   : > { %2758 = sst [smem:[#allocation28_spill]] %s2335_s15  ;;  %s2760_s1 = sld [smem:[#allocation29_spill]] }
  0x46   : > { %s2759_s14 = scalar_select %p2337_p3, 1, 0 }
  0x47   : > { %s413_s11 = scalar_lea.vmem [#allocation7], %s2329_s29  ;;  %s2149_s16 = smov [#allocation12]  }
  0x48   : > { %s420_s21 = sshll.u32 %s413_s11, 4  ;;  %s2351_s15 = sshll.u32 %s2149_s16, 4  ;;  %s2349_s21 = int_to_ptr.vmem [resolvable:$true] %s420_s21  ;;  %s360_s15 = int_to_ptr.vmem [resolvable:$true] %s2351_s15 }
  0x49   : > { %s2353_s24 = scalar_lea.sflag [#allocation8], %s409_s17  ;;  %p2359_p7 = pneg %p2337_p3 }
  0x4b   : > { %s2346_s13 = scalar_lea.hbm %s2760_s1, %s2332_s26  ;;  %s1909_s22 = scalar_lea.hbm %s2760_s1, 128 }
  0x4c   : > { %s1904_s10 = scalar_lea.hbm %s2346_s13, 64  ;;  %p1910_p2 = scmp.lt.u32.totalorder %s2346_s13, %s2760_s1 }
  0x4d   : > { %p1905_p5 = scmp.ne.s32.totalorder %s2346_s13, %s1904_s10  ;;  %p1911_p4 = scmp.lt.u32.totalorder %s1909_s22, %s1904_s10 }
  0x4e   : > { %s2761_s3 = scalar_select %p2359_p7, 1, 0 }
  0x4f   : > { %p1907_p9 = pnand %p2359_p7, %p1905_p5  ;;  %p1912_p6 = por %p1911_p4, %p1910_p2 }
  0x50   : > { %p1913_p8 = scmp.lt.u32.totalorder %s1904_s10, %s2346_s13 }
  0x51   : > { %p1908_p1 = pneg %p1907_p9 }
  0x52   : > { %p1914_p12 = por %p1913_p8, %p1912_p6 }
  0x54   : > { %p1915_p0 = pnand %p1914_p12, %p1908_p1 }
  0x56   : > { %1918 = shalt.err (!%p1915_p0)
}
  0x57   : > { %s1919_s17 = scalar_lea.vmem %s2349_s21, 64  ;;  %s2150_s12 = smov [#allocation7]  }
  0x58   : > { %p1920_p5 = scmp.ne.s32.totalorder %s2349_s21, %s1919_s17  ;;  %s1924_s11 = sshll.u32 %s2150_s12, 4  ;;  %s1925_s11 = int_to_ptr.vmem [resolvable:$false] %s1924_s11 }
  0x59   : > { %s1926_s20 = scalar_lea.vmem %s1925_s11, 128  ;;  %p1927_p11 = scmp.lt.s32.totalorder %s2349_s21, %s1925_s11 }
  0x5a   : > { %p1922_p9 = pnand %p1920_p5, %p2359_p7  ;;  %p1928_p13 = scmp.lt.s32.totalorder %s1926_s20, %s1919_s17 }
  0x5c   : > { %p1923_p10 = pneg %p1922_p9  ;;  %p1929_p2 = por %p1928_p13, %p1927_p11 }
  0x5e   : > { %p1930_p4 = pnand %p1929_p2, %p1923_p10 }
  0x60   : > { %1933 = shalt.err (!%p1930_p4)
}
  0x61   : > { %1778 = dma.hbm_to_vmem [thread:$0]  (!%p2337_p3), %s2346_s13, 64, %s2349_s21, %s2353_s24  }
  0x62   : > { %s1934_s16 = scalar_lea.hbm %s2706_s7, 256  ;;  %p2762_p11 = scmp.ne.s32.totalorder %s2753_s28, 0 }
  0x63   : > { %p1935_p1 = scmp.ne.s32.totalorder %s2706_s7, %s1934_s16  ;;  %p1941_p6 = scmp.lt.u32.totalorder %s1934_s16, %s2706_s7 }
  0x65   : > { %p1937_p13 = pnand %p1935_p1, %p2762_p11 }
  0x67   : > { %p1938_p10 = pneg %p1937_p13 }
  0x69   : > { %p1943_p8 = pnand %p1941_p6, %p1938_p10 }
  0x6b   : > { %1946 = shalt.err (!%p1943_p8)
}
  0x6c   : > { %s1947_s20 = scalar_lea.vmem %s360_s15, 256  ;;  %p1955_p9 = scmp.lt.s32.totalorder %s360_s15, %s360_s15 }
  0x6d   : > { %p1948_p12 = scmp.ne.s32.totalorder %s360_s15, %s1947_s20  ;;  %p1956_p2 = scmp.lt.s32.totalorder %s1947_s20, %s1947_s20 }
  0x6f   : > { %p1950_p0 = pnand %p1948_p12, %p2762_p11  ;;  %p1957_p4 = por %p1956_p2, %p1955_p9 }
  0x71   : > { %p1951_p5 = pneg %p1950_p0 }
  0x73   : > { %p1958_p3 = pnand %p1957_p4, %p1951_p5 }
  0x75   : > { %1961 = shalt.err (!%p1958_p3)
}
  0x76   : > { %p2763_p1 = scmp.ne.s32.totalorder %s2751_s30, 0  ;;  %s2764_s1 = smov 4  }
  0x77   : > { %s2765_s21 = smov 64   ;;  %s2151_s22 = smov [#allocation13]  }
  0x78   : > { %1768 = dma.hbm_to_vmem [thread:$0]  (!%p2763_p1), %s2706_s7, 256, %s360_s15, [#allocation11], %s2765_s21, %s2765_s21, %s2764_s1  }
  0x79   : > { %s373_s16 = sshll.u32 %s2151_s22, 4  ;;  %s1962_s11 = scalar_lea.hbm %s2707_s8, 16  ;;  %s374_s16 = int_to_ptr.vmem [resolvable:$true] %s373_s16 }
  0x7a   : > { %p1963_p3 = scmp.ne.s32.totalorder %s2707_s8, %s1962_s11  ;;  %p1969_p6 = scmp.lt.u32.totalorder %s1962_s11, %s2707_s8 }
  0x7c   : > { %p1965_p13 = pnand %p1963_p3, %p2762_p11 }
  0x7e   : > { %p1966_p10 = pneg %p1965_p13 }
  0x80   : > { %p1971_p8 = pnand %p1969_p6, %p1966_p10 }
  0x82   : > { %1974 = shalt.err (!%p1971_p8)
}
  0x83   : > { %s1975_s15 = scalar_lea.vmem %s374_s16, 16  ;;  %s1982_s1 = scalar_lea.vmem %s374_s16, 32 }
  0x84   : > { %p1976_p12 = scmp.ne.s32.totalorder %s374_s16, %s1975_s15  ;;  %p1983_p9 = scmp.lt.s32.totalorder %s374_s16, %s374_s16 }
  0x85   : > { %p1984_p2 = scmp.lt.s32.totalorder %s1982_s1, %s1975_s15 }
  0x86   : > { %p1978_p0 = pnand %p1976_p12, %p2762_p11 }
  0x87   : > { %p1985_p4 = por %p1984_p2, %p1983_p9 }
  0x88   : > { %p1979_p5 = pneg %p1978_p0 }
  0x8a   : > { %p1986_p7 = pnand %p1985_p4, %p1979_p5 }
  0x8c   : > { %1989 = shalt.err (!%p1986_p7)
}
  0x8d   : > { %1771 = dma.hbm_to_vmem [thread:$0]  (!%p2763_p1), %s2707_s8, 16, %s374_s16, [#allocation14]  }
  0x8e   : > { %s2427_s28 = scalar_lea.hbm %s2699_s0, %s2332_s26  ;;  %s394_s13 = scalar_lea.vmem [#allocation4], %s2329_s29 }
  0x8f   : > { %s402_s10 = sshll.u32 %s394_s13, 4  ;;  %s2766_s30 = sand.u32 1, %s2132_s19   ;;  %s403_s10 = int_to_ptr.vmem [resolvable:$true] %s402_s10 }
  0x90   : > { %s391_s22 = scalar_lea.sflag [#allocation5], %s2766_s30  ;;  %s1990_s12 = scalar_lea.hbm %s2427_s28, 64 }
  0x91   : > { %p1991_p7 = scmp.ne.s32.totalorder %s2427_s28, %s1990_s12  ;;  %p2767_p11 = scmp.ne.s32.totalorder %s2761_s3, 0 }
  0x92   : > { %s1995_s11 = scalar_lea.hbm %s2699_s0, 128  ;;  %p1996_p1 = scmp.lt.u32.totalorder %s2427_s28, %s2699_s0 }
  0x93   : > { %p1993_p3 = pnand %p1991_p7, %p2767_p11  ;;  %p1997_p10 = scmp.lt.u32.totalorder %s1995_s11, %s1990_s12 }
  0x94   : > { %p1999_p8 = scmp.lt.u32.totalorder %s1990_s12, %s2427_s28 }
  0x95   : > { %p1994_p13 = pneg %p1993_p3  ;;  %p1998_p6 = por %p1997_p10, %p1996_p1 }
  0x97   : > { %p2000_p12 = por %p1999_p8, %p1998_p6 }
  0x99   : > { %p2001_p0 = pnand %p2000_p12, %p1994_p13 }
  0x9b   : > { %2004 = shalt.err (!%p2001_p0)
}
  0x9c   : > { %s2005_s1 = scalar_lea.vmem %s403_s10, 64  ;;  %s2152_s9 = smov [#allocation4]  }
  0x9d   : > { %p2006_p5 = scmp.ne.s32.totalorder %s403_s10, %s2005_s1  ;;  %s2010_s21 = sshll.u32 %s2152_s9, 4  ;;  %s2011_s21 = int_to_ptr.vmem [resolvable:$false] %s2010_s21 }
  0x9e   : > { %s2012_s4 = scalar_lea.vmem %s2011_s21, 128  ;;  %p2013_p4 = scmp.lt.s32.totalorder %s403_s10, %s2011_s21 }
  0x9f   : > { %p2008_p9 = pnand %p2006_p5, %p2767_p11  ;;  %p2014_p7 = scmp.lt.s32.totalorder %s2012_s4, %s2005_s1 }
  0xa1   : > { %p2009_p2 = pneg %p2008_p9  ;;  %p2015_p3 = por %p2014_p7, %p2013_p4 }
  0xa3   : > { %p2016_p1 = pnand %p2015_p3, %p2009_p2 }
  0xa5   : > { %2019 = shalt.err (!%p2016_p1)
}
  0xa6   : > { %p2768_p10 = scmp.ne.s32.totalorder %s2759_s14, 0  ;;  %s2453_s30 = scalar_lea.hbm %s2701_s2, %s2332_s26 }
  0xa7   : > { %s431_s12 = scalar_lea.vmem [#allocation9], %s2329_s29  ;;  %s2020_s17 = scalar_lea.hbm %s2453_s30, 64 }
  0xa8   : > { %1775 = dma.hbm_to_vmem [thread:$0]  (!%p2768_p10), %s2427_s28, 64, %s403_s10, %s391_s22  }
  0xa9   : > { %s438_s16 = sshll.u32 %s431_s12, 4  ;;  %p2021_p13 = scmp.ne.s32.totalorder %s2453_s30, %s2020_s17  ;;  %s439_s16 = int_to_ptr.vmem [resolvable:$true] %s438_s16 }
  0xaa   : > { %s2025_s28 = scalar_lea.hbm %s2701_s2, 128  ;;  %p2026_p12 = scmp.lt.u32.totalorder %s2453_s30, %s2701_s2 }
  0xab   : > { %p2023_p6 = pnand %p2021_p13, %p2767_p11  ;;  %p2027_p0 = scmp.lt.u32.totalorder %s2025_s28, %s2020_s17 }
  0xac   : > { %p2029_p9 = scmp.lt.u32.totalorder %s2020_s17, %s2453_s30 }
  0xad   : > { %p2024_p8 = pneg %p2023_p6  ;;  %p2028_p5 = por %p2027_p0, %p2026_p12 }
  0xaf   : > { %p2030_p2 = por %p2029_p9, %p2028_p5 }
  0xb1   : > { %p2031_p4 = pnand %p2030_p2, %p2024_p8 }
  0xb3   : > { %2034 = shalt.err (!%p2031_p4)
}
  0xb4   : > { %s2035_s29 = scalar_lea.vmem %s439_s16, 64  ;;  %s2153_s26 = smov [#allocation9]  }
  0xb5   : > { %p2036_p7 = scmp.ne.s32.totalorder %s439_s16, %s2035_s29  ;;  %s2040_s15 = sshll.u32 %s2153_s26, 4  ;;  %s2041_s15 = int_to_ptr.vmem [resolvable:$false] %s2040_s15 }
  0xb6   : > { %s2042_s1 = scalar_lea.vmem %s2041_s15, 128  ;;  %p2043_p13 = scmp.lt.s32.totalorder %s439_s16, %s2041_s15 }
  0xb7   : > { %p2038_p3 = pnand %p2036_p7, %p2767_p11  ;;  %p2044_p6 = scmp.lt.s32.totalorder %s2042_s1, %s2035_s29 }
  0xb9   : > { %p2039_p1 = pneg %p2038_p3  ;;  %p2045_p10 = por %p2044_p6, %p2043_p13 }
  0xbb   : > { %p2046_p0 = pnand %p2045_p10, %p2039_p1 }
  0xbd   : > { %2049 = shalt.err (!%p2046_p0)
}
  0xbe   : > { %p2769_p12 = scmp.ne.s32.totalorder %s2759_s14, 0  ;;  %p2770_p8 = scmp.ne.s32.totalorder %s2750_s27, 0 }
  0xbf   : > { %s2477_s3 = sand.u32 (!%p2770_p8), 1, %s2128_s18   ;;  %p2771_p11 = scmp.ne.s32.totalorder (!%p2770_p8), %s2747_s25, 0 }
  0xc0   : > { %1781 = dma.hbm_to_vmem [thread:$0]  (!%p2769_p12), %s2453_s30, 64, %s439_s16, %s2353_s24  }
  0xc1   : > { %447 = sbr.rel (%p2770_p8) target bundleno = 2828 (0xb0c), region = 64  ;;  %s2480_s9 = sshll.u32 (!%p2770_p8), %s2477_s3, 2 }
  0xc2   : > { %s450_s21 = scalar_lea.sflag (!%p2770_p8), [#allocation5], %s2477_s3  ;;  %s453_s4 = scalar_lea.vmem (!%p2770_p8), [#allocation4], %s2480_s9 }
  0xc8   : > { %2103 = dma.done.wait (%p2771_p11), %s450_s21, 64  }
  0xc9   : > { %2105 = vsyncadd (%p2771_p11), %s450_s21, 4294967232  ;;  %s458_s27 = sand.u32 1, %s2251_s23   ;;  %s462_s24 = scalar_lea.vmem [#allocation7], %s2480_s9 }
  0xca   : > { %s459_s14 = scalar_lea.sflag [#allocation8], %s458_s27 }
  0xcb   : > { %2107 = dma.done.wait (%p2771_p11), %s459_s14, 128  }
  0xcc   : > { %2109 = vsyncadd (%p2771_p11), %s459_s14, 4294967168  ;;  %s471_s6 = scalar_lea.vmem [#allocation9], %s2480_s9  ;;  %p2772_p10 = scmp.eq.s32.totalorder %s2251_s23, 0 }
  0xce   : > { %2111 = dma.done.wait (%p2772_p10), [#allocation11], 512   ;;  %p2773_p5 = pmov %p2772_p10 }
  0xd0   : > { %2113 = vsyncadd (%p2773_p5), [#allocation11], 4294966784  ;;  %p2774_p9 = pmov %p2773_p5 }
  0xd1   : > { %p2775_p2 = pmov %p2773_p5 }
  0xd2   : > { %2115 = dma.done.wait (%p2774_p9), [#allocation14], 16  }
  0xd3   : > { %2117 = vsyncadd (%p2775_p2), [#allocation14], 4294967280  ;;  %v2154_v0 = vmov 0.0   ;;  %vm2155_vm0 = vmmov 0   ;;  %v1852_v1 = vld [vmem:[%s2704_s5] sm:$0xff]   ;;  %v1853_v2 = vld [vmem:[%s2704_s5 + $0x8] sm:$0xff]  }
  0xd4   : > { %1646 = vmatprep.subr.bf16.mxu0 %v2154_v0  ;;  %1650 = vmatprep.mubr.msk.bf16.mxu0 %vm2155_vm0, %v2154_v0  ;;  %v537_v3 = vld [vmem:[%s462_s24] sm:$0xf]  ;;  %vm561_vm1 = vcmask 261120   ;;  %v1854_v4 = vld [vmem:[#allocation10] sm:$0xff]   ;;  %v1855_v5 = vld [vmem:[#allocation10 + $0x8] sm:$0xff]   ;;  %s2776_s17 = sld [smem:[#allocation32_spill]] }
  0xd5   : > { %1654 = vmatprep.subr.bf16.mxu1 %v2154_v0  ;;  %1658 = vmatprep.mubr.msk.bf16.mxu1 %vm2155_vm0, %v2154_v0  ;;  %v677_v6 = vld [vmem:[%s453_s4] sm:$0xf]  ;;  %v1856_v7 = vld [vmem:[#allocation12] sm:$0xff]   ;;  %v1857_v8 = vld [vmem:[#allocation12 + $0x8] sm:$0xff]   ;;  %vm673_vm2 = vcmask 257024   ;;  %vm752_vm3 = vcmask 64512  }
  0xd6   : > { %1647 = vmatpush3.bf16.msra.mxu0 %v1852_v1  ;;  %1655 = vmatpush3.bf16.msra.mxu1 %v1856_v7  ;;  %v605_v9 = vld [vmem:[%s471_s6] sm:$0xf]  ;;  %s2777_s28 = sld [smem:[#allocation31_spill]]  ;;  %s2156_s10 = smov 120   ;;  %v1586_v27 = vld [vmem:[#allocation13] ss:$0 sm:$0xff] }
  0xd7   : > { %1648 = vmatprep.subr.bf16.mxu0 %v2154_v0  ;;  %1656 = vmatprep.subr.bf16.mxu1 %v2154_v0  ;;  %vm814_vm4 = vcmask 1043456   ;;  %s2157_s22 = smov 112   ;;  %s2778_s15 = sld [smem:[#allocation33_spill]] }
  0xd8   : > { %s2158_s21 = smov 104   ;;  %s2779_s6 = sld [smem:[#allocation22_spill]] }
  0xd9   : > { %s1581_s25 = sshll.u32 %s2477_s3, 3  ;;  %s2780_s30 = sld [smem:[#allocation34_spill]] }
  0xda   : > { %1649 = vmatpush3.bf16.msra.mxu0 %v1853_v2  ;;  %1657 = vmatpush3.bf16.msra.mxu1 %v1857_v8  ;;  %v1582_v10 = vld [vmem:[%s2776_s17] ss:$0 sm:$0xff]  ;;  %s2781_s12 = sld [smem:[#allocation27_spill]]  ;;  %s531_s17 = scalar_lea.vmem [#allocation15], %s1581_s25 }
  0xdb   : > { %1662 = vmatprep.subr.bf16.mxu0 %v2154_v0  ;;  %1670 = vmatprep.subr.bf16.mxu1 %v2154_v0  ;;  %s1409_s11 = sshll.u32 %s531_s17, 4  ;;  %s1395_s29 = scalar_lea.sflag [#allocation6], %s2477_s3  ;;  %s2651_s11 = int_to_ptr.vmem [resolvable:$true] %s1409_s11 }
  0xdc   : > { %v1590_v19 = vld [vmem:[%s2777_s28] ss:$0 sm:$0xff]  ;;  %s2050_s26 = scalar_lea.vmem %s2651_s11, 128  ;;  %s2159_s1 = smov [#allocation15]  }
  0xdd   : > { %1651 = vmatmul.mubr.msk.bf16.vlgmr.msra.gmra.mrb[0].mxu0 %vm561_vm1, %v537_v3  ;;  %1659 = vmatmul.mubr.msk.bf16.vlgmr.msra.gmra.mrb[0].mxu1 %vm561_vm1, %v605_v9  ;;  %v749_v1 = vld [vmem:[%s2778_s15 + $0x4] sm:$0xf]  ;;  %v748_v7 = vld [vmem:[%s2778_s15] sm:$0xf]  ;;  %p2051_p4 = scmp.ne.s32.totalorder %s2651_s11, %s2050_s26  ;;  %s2054_s9 = sshll.u32 %s2159_s1, 4  ;;  %s2055_s9 = int_to_ptr.vmem [resolvable:$false] %s2054_s9 }
  0xde   : > { %1663 = vmatpush3.bf16.msra.mxu0 %v1854_v4  ;;  %1666 = vmatprep.mubr.msk.bf16.mxu0 %vm2155_vm0, %v2154_v0  ;;  %v981_v2 = vsel %vm814_vm4, %v749_v1, 0  ;;  %s1610_s16 = sshll.u32 %s2779_s6, 7  ;;  %p2057_p13 = scmp.lt.s32.totalorder %s2651_s11, %s2055_s9 }
  0xdf   : > { %1664 = vmatprep.subr.bf16.mxu0 %v2154_v0  ;;  %1672 = vmatprep.mubr.msk.bf16.mxu1 %vm2155_vm0, %v2154_v0 }
  0xe0   : > { %p2783_p7 = scmp.ne.s32.totalorder %s2781_s12, 0 }
  0xe2   : > { %1665 = vmatpush3.bf16.msra.mxu0 %v1855_v5  ;;  %p2052_p3 = pnand %p2051_p4, %p2783_p7 }
  0xe3   : > { %1676 = vmatprep.subr.bf16.mxu0 %v2154_v0 }
  0xe4   : > { %p2053_p1 = pneg %p2052_p3 }
  0xe5   : > { %1667 = vmatmul.mubr.msk.bf16.vlgmr.msra.gmra.mrb[4].mxu0 %vm561_vm1, %v677_v6 }
  0xe6   : > { %1678 = vmatprep.mubr.msk.bf16.mxu0 %vm2155_vm0, %v2154_v0 }
 0x1b0   : > { %v599_v11 = vpop.f32.mrb[0].mxu0  ;;  %v666_v28 = vpop.f32.mrb[0].mxu1 }
 0x1b1   : > { %v600_v12 = vadd.f32 %v1582_v10, %v599_v11  ;;  %v1652_v13 = vpop.f32.mrb[1].mxu0  ;;  %v667_v29 = vadd.f32 %v1586_v27, %v666_v28  ;;  %v1660_v30 = vpop.f32.mrb[1].mxu1  ;;  %v1027_v10 = vsel %vm814_vm4, %v748_v7, 0 }
 0x1b2   : > { %v602_v14 = vpop.f32.mrb[2].mxu0  ;;  %v669_v31 = vpop.f32.mrb[2].mxu1 }
 0x1b3   : > { %v672_v15 = vpack.c.bf16 %v600_v12, %v600_v12  ;;  %v1653_v16 = vpop.f32.mrb[3].mxu0  ;;  %v675_v32 = vpack.c.bf16 %v667_v29, %v667_v29  ;;  %v1661_v33 = vpop.f32.mrb[3].mxu1 }
 0x1b5   : > { %674 = vst.msk [vmem:[#allocation2] sm:$0xf] %vm673_vm2, %v672_v15  ;;  %676 = vst.msk [vmem:[#allocation3] sm:$0xf] %vm673_vm2, %v675_v32 }
 0x1b8   : > { %v739_v17 = vpop.f32.mrb[4].mxu0 }
 0x1b9   : > { %v1668_v18 = vpop.f32.mrb[5].mxu0  ;;  %v740_v25 = vadd.f32 %v1590_v19, %v739_v17 }
 0x1ba   : > { %v742_v20 = vpop.f32.mrb[6].mxu0 }
 0x1bb   : > { %v1669_v21 = vpop.f32.mrb[7].mxu0  ;;  %v2547_v26 = vpack.c.bf16 %v740_v25, %v740_v25 }
 0x1bc   : > { %v746_v22 = vld [vmem:[#allocation2] sm:$0xf]  ;;  %v747_v34 = vld [vmem:[#allocation3] sm:$0xf] }
 0x1bd   : > { %v757_v23 = vsel %vm752_vm3, %v746_v22, 0  ;;  %v2542_v24 = vcombine.low %v746_v22, %v746_v22  ;;  %v816_v35 = vsel %vm814_vm4, %v747_v34, 0  ;;  %v2566_v54 = vcombine.low %v747_v34, %v747_v34 }
 0x1be   : > { %1671 = vmatpush3.bf16.xpose.msra.mxu1 %v757_v23  ;;  %1677 = vmatpush3.bf16.msra.mxu0 %v816_v35 }
 0x1bf   : > { %865 = vrot.lane.b32.xlu0 %v2542_v24, %s2156_s10  ;;  %1682 = vmatprep.subr.bf16.mxu1 %v2154_v0 }
 0x1c0   : > { %1688 = vmatprep.subr.bf16.mxu0 %v2154_v0 }
 0x1c3   : > { %860 = vrot.lane.b32.xlu0 %v2547_v26, %s2156_s10 }
 0x1c5   : > { %1673 = vmatmul.mubr.msk.bf16.vlgmr.msra.gmra.mrb[4].mxu1 %vm752_vm3, %v2547_v26 }
 0x1c6   : > { %1684 = vmatprep.mubr.msk.bf16.mxu1 %vm2155_vm0, %v2154_v0 }
 0x231   : > { %v866_v36 = vpop.permute.xlu0 %865 }
 0x232   : > { %v871_v37 = vsel %vm752_vm3, %v866_v36, 0 }
 0x233   : > { %1683 = vmatpush3.bf16.xpose.msra.mxu1 %v871_v37 }
 0x234   : > { %1694 = vmatprep.subr.bf16.mxu1 %v2154_v0 }
 0x235   : > { %v861_v38 = vpop.permute.xlu0 %860 }
 0x23a   : > { %1685 = vmatmul.mubr.msk.bf16.vlgmr.msra.gmra.mrb[8].mxu1 %vm752_vm3, %v861_v38 }
 0x23b   : > { %1696 = vmatprep.mubr.msk.bf16.mxu1 %vm2155_vm0, %v2154_v0  ;;  %1695 = vmatpush3.bf16.msra.mxu1 %v981_v2 }
 0x23c   : > { %1706 = vmatprep.subr.bf16.mxu1 %v2154_v0 }
 0x298   : > { %v793_v39 = vpop.f32.mrb[4].mxu1 }
 0x299   : > { %v1674_v40 = vpop.f32.mrb[5].mxu1  ;;  %v799_v41 = vsel %vm752_vm3, %v793_v39, -inf }
 0x29a   : > { %800 = vmax.xlane.f32.xlu1 %v799_v41  ;;  %v796_v42 = vpop.f32.mrb[6].mxu1 }
 0x29b   : > { %v1675_v43 = vpop.f32.mrb[7].mxu1 }
 0x30d   : > { %v907_v44 = vpop.f32.mrb[8].mxu1 }
 0x30e   : > { %v1686_v45 = vpop.f32.mrb[9].mxu1  ;;  %v913_v46 = vsel %vm752_vm3, %v907_v44, -inf }
 0x30f   : > { %914 = vmax.xlane.f32.xlu1 %v913_v46  ;;  %v910_v47 = vpop.f32.mrb[10].mxu1 }
 0x310   : > { %v1687_v48 = vpop.f32.mrb[11].mxu1 }
 0x327   : > { %v801_v49 = vpop.xlane.xlu1 %800 }
 0x328   : > { %v802_v50 = vsub.f32 %v793_v39, %v801_v49 }
 0x32a   : > { %v803_v51 = vmul.f32 1.442695, %v802_v50 }
 0x32c   : > { %1860 = vpow2.f32 %v803_v51 }
 0x336   : > { %v1861_v52 = vpop.eup %1860 }
 0x337   : > { %v805_v53 = vsel %vm752_vm3, %v1861_v52, 0.0 }
 0x338   : > { %806 = vadd.xlane.f32.xlu0 %v805_v53 }
 0x34e   : > { %1131 = vrot.lane.b32.xlu0 %v2566_v54, %s2157_s22 }
 0x39c   : > { %v915_v55 = vpop.xlane.xlu1 %914 }
 0x39d   : > { %v916_v56 = vsub.f32 %v907_v44, %v915_v55 }
 0x39f   : > { %v917_v57 = vmul.f32 1.442695, %v916_v56 }
 0x3a1   : > { %1862 = vpow2.f32 %v917_v57 }
 0x3ab   : > { %v1863_v58 = vpop.eup %1862 }
 0x3ac   : > { %v919_v59 = vsel %vm752_vm3, %v1863_v58, 0.0 }
 0x3ad   : > { %920 = vadd.xlane.f32.xlu1 %v919_v59 }
 0x3be   : > { %928 = vrot.lane.b32.xlu1 %v2566_v54, %s2156_s10  ;;  %s2782_s10 = sld [smem:[#allocation35_spill]] }
 0x3c2   : > { %1071 = vrot.lane.b32.xlu1 %v2542_v24, %s2157_s22 }
 0x3c5   : > { %v807_v60 = vpop.xlane.xlu0 %806 }
 0x3c6   : > { %1864 = vrcp.f32 %v807_v60  ;;  %1069 = vrot.lane.b32.xlu1 %v2547_v26, %s2157_s22  ;;  %s2649_s22 = scalar_lea.hbm %s2782_s10, %s1610_s16 }
 0x3c9   : > { %v1132_v11 = vpop.permute.xlu0 %1131 }
 0x3ca   : > { %v1137_v16 = vsel %vm814_vm4, %v1132_v11, 0 }
 0x3d0   : > { %v1865_v61 = vpop.eup %1864 }
 0x3d1   : > { %v809_v62 = vmul.f32 %v1865_v61, %v1861_v52 }
 0x3d3   : > { %v810_v63 = vpack.c.bf16 %v809_v62, %v809_v62 }
 0x3d5   : > { %1679 = vmatmul.mubr.msk.bf16.vlgmr.msra.gmra.mrb[8].mxu0 %vm752_vm3, %v810_v63 }
 0x3d6   : > { %1690 = vmatprep.mubr.msk.bf16.mxu0 %vm2155_vm0, %v2154_v0 }
 0x43a   : > { %v921_v3 = vpop.xlane.xlu1 %920 }
 0x43b   : > { %1866 = vrcp.f32 %v921_v3 }
 0x43e   : > { %v929_v4 = vpop.permute.xlu1 %928 }
 0x43f   : > { %v934_v5 = vsel %vm814_vm4, %v929_v4, 0 }
 0x440   : > { %1689 = vmatpush3.bf16.msra.mxu0 %v934_v5 }
 0x441   : > { %1700 = vmatprep.subr.bf16.mxu0 %v2154_v0 }
 0x442   : > { %v1072_v18 = vpop.permute.xlu1 %1071 }
 0x443   : > { %v1077_v23 = vsel %vm752_vm3, %v1072_v18, 0 }
 0x445   : > { %v1867_v6 = vpop.eup %1866 }
 0x446   : > { %v923_v8 = vmul.f32 %v1867_v6, %v1863_v58  ;;  %v1070_v27 = vpop.permute.xlu1 %1069 }
 0x448   : > { %v924_v9 = vpack.c.bf16 %v923_v8, %v923_v8 }
 0x44a   : > { %1691 = vmatmul.mubr.msk.bf16.vlgmr.msra.gmra.mrb[12].mxu0 %vm752_vm3, %v924_v9 }
 0x44b   : > { %1701 = vmatpush3.bf16.msra.mxu0 %v1027_v10  ;;  %1702 = vmatprep.mubr.msk.bf16.mxu0 %vm2155_vm0, %v2154_v0 }
 0x44c   : > { %1712 = vmatprep.subr.bf16.mxu0 %v2154_v0 }
 0x4a8   : > { %v852_v12 = vpop.f32.mrb[8].mxu0 }
 0x4a9   : > { %v858_v13 = vpack.c.bf16 %v852_v12, %v852_v12  ;;  %v1680_v14 = vpop.f32.mrb[9].mxu0 }
 0x4aa   : > { %v855_v15 = vpop.f32.mrb[10].mxu0 }
 0x4ab   : > { %v1681_v17 = vpop.f32.mrb[11].mxu0  ;;  %1703 = vmatmul.mubr.msk.bf16.vlgmr.msra.gmra.mrb[16].mxu0 %vm752_vm3, %v858_v13 }
 0x4ac   : > { %1713 = vmatpush3.bf16.msra.mxu0 %v1137_v16  ;;  %1714 = vmatprep.mubr.msk.bf16.mxu0 %vm2155_vm0, %v2154_v0 }
 0x4ad   : > { %1724 = vmatprep.subr.bf16.mxu0 %v2154_v0 }
 0x51d   : > { %v970_v19 = vpop.f32.mrb[12].mxu0 }
 0x51e   : > { %v976_v20 = vpack.c.bf16 %v970_v19, %v970_v19  ;;  %v1692_v21 = vpop.f32.mrb[13].mxu0 }
 0x51f   : > { %v973_v22 = vpop.f32.mrb[14].mxu0 }
 0x520   : > { %v1693_v25 = vpop.f32.mrb[15].mxu0  ;;  %1697 = vmatmul.mubr.msk.bf16.vlgmr.msra.gmra.mrb[12].mxu1 %vm752_vm3, %v976_v20 }
 0x521   : > { %1707 = vmatpush3.bf16.xpose.msra.mxu1 %v1077_v23  ;;  %1708 = vmatprep.mubr.msk.bf16.mxu1 %vm2155_vm0, %v2154_v0  ;;  %v1608_v25 = vld [vmem:[%s2780_s30] ss:$0 sm:$0xff] }
 0x522   : > { %1718 = vmatprep.subr.bf16.mxu1 %v2154_v0 }
 0x528   : > { %1709 = vmatmul.mubr.msk.bf16.vlgmr.msra.gmra.mrb[16].mxu1 %vm752_vm3, %v1070_v27 }
 0x529   : > { %1720 = vmatprep.mubr.msk.bf16.mxu1 %vm2155_vm0, %v2154_v0 }
 0x57e   : > { %v1063_v28 = vpop.f32.mrb[16].mxu0 }
 0x57f   : > { %v1704_v29 = vpop.f32.mrb[17].mxu0 }
 0x580   : > { %v1066_v30 = vpop.f32.mrb[18].mxu0 }
 0x581   : > { %v1705_v31 = vpop.f32.mrb[19].mxu0 }
 0x5f3   : > { %v1017_v32 = vpop.f32.mrb[12].mxu1 }
 0x5f4   : > { %v2605_v33 = vadd.f32 %v1063_v28, %v1017_v32  ;;  %v1698_v34 = vpop.f32.mrb[13].mxu1 }
 0x5f5   : > { %v1020_v35 = vpop.f32.mrb[14].mxu1 }
 0x5f6   : > { %v1699_v36 = vpop.f32.mrb[15].mxu1 }
 0x5fb   : > { %v1113_v37 = vpop.f32.mrb[16].mxu1 }
 0x5fc   : > { %v1710_v38 = vpop.f32.mrb[17].mxu1  ;;  %v1119_v39 = vsel %vm752_vm3, %v1113_v37, -inf }
 0x5fd   : > { %1120 = vmax.xlane.f32.xlu1 %v1119_v39  ;;  %v1116_v40 = vpop.f32.mrb[18].mxu1 }
 0x5fe   : > { %v1711_v41 = vpop.f32.mrb[19].mxu1 }
 0x68a   : > { %v1121_v42 = vpop.xlane.xlu1 %1120 }
 0x68b   : > { %v1122_v43 = vsub.f32 %v1113_v37, %v1121_v42 }
 0x68d   : > { %v1123_v44 = vmul.f32 1.442695, %v1122_v43 }
 0x68f   : > { %1868 = vpow2.f32 %v1123_v44 }
 0x699   : > { %v1869_v45 = vpop.eup %1868 }
 0x69a   : > { %v1125_v46 = vsel %vm752_vm3, %v1869_v45, 0.0 }
 0x69b   : > { %1126 = vadd.xlane.f32.xlu0 %v1125_v46 }
 0x6b1   : > { %1229 = vrot.lane.b32.xlu0 %v2542_v24, %s2158_s21 }
 0x6b5   : > { %1227 = vrot.lane.b32.xlu0 %v2547_v26, %s2158_s21  ;;  %v750_v26 = vld [vmem:[%s2778_s15 + $0x8] sm:$0xf] }
 0x6b6   : > { %v1184_v53 = vsel %vm814_vm4, %v750_v26, 0 }
 0x6b7   : > { %1719 = vmatpush3.bf16.msra.mxu1 %v1184_v53 }
 0x6b8   : > { %1730 = vmatprep.subr.bf16.mxu1 %v2154_v0 }
 0x728   : > { %v1127_v47 = vpop.xlane.xlu0 %1126 }
 0x729   : > { %1870 = vrcp.f32 %v1127_v47 }
 0x72c   : > { %v1230_v50 = vpop.permute.xlu0 %1229 }
 0x72d   : > { %v1235_v52 = vsel %vm752_vm3, %v1230_v50, 0 }
 0x730   : > { %v1228_v24 = vpop.permute.xlu0 %1227 }
 0x733   : > { %v1871_v48 = vpop.eup %1870 }
 0x734   : > { %v1129_v49 = vmul.f32 %v1871_v48, %v1869_v45 }
 0x736   : > { %v1130_v51 = vpack.c.bf16 %v1129_v49, %v1129_v49 }
 0x738   : > { %1715 = vmatmul.mubr.msk.bf16.vlgmr.msra.gmra.mrb[20].mxu0 %vm752_vm3, %v1130_v51 }
 0x739   : > { %1725 = vmatpush3.bf16.xpose.msra.mxu0 %v1235_v52  ;;  %1726 = vmatprep.mubr.msk.bf16.mxu0 %vm2155_vm0, %v2154_v0 }
 0x73a   : > { %1736 = vmatprep.subr.bf16.mxu0 %v2154_v0 }
 0x740   : > { %1727 = vmatmul.mubr.msk.bf16.vlgmr.msra.gmra.mrb[24].mxu0 %vm752_vm3, %v1228_v24 }
 0x741   : > { %1738 = vmatprep.mubr.msk.bf16.mxu0 %vm2155_vm0, %v2154_v0 }
 0x80b   : > { %v1173_v55 = vpop.f32.mrb[20].mxu0 }
 0x80c   : > { %v1179_v56 = vpack.c.bf16 %v1173_v55, %v1173_v55  ;;  %v1716_v57 = vpop.f32.mrb[21].mxu0 }
 0x80d   : > { %v1176_v58 = vpop.f32.mrb[22].mxu0 }
 0x80e   : > { %v1717_v59 = vpop.f32.mrb[23].mxu0  ;;  %1721 = vmatmul.mubr.msk.bf16.vlgmr.msra.gmra.mrb[20].mxu1 %vm752_vm3, %v1179_v56 }
 0x80f   : > { %1732 = vmatprep.mubr.msk.bf16.mxu1 %vm2155_vm0, %v2154_v0  ;;  %v751_v0 = vld [vmem:[%s2778_s15 + $0xc] sm:$0xf] }
 0x810   : > { %v1342_v7 = vsel %vm814_vm4, %v751_v0, 0 }
 0x811   : > { %1737 = vmatpush3.bf16.msra.mxu0 %v1342_v7 }
 0x813   : > { %v1271_v60 = vpop.f32.mrb[24].mxu0 }
 0x814   : > { %v1728_v61 = vpop.f32.mrb[25].mxu0  ;;  %v1277_v62 = vsel %vm752_vm3, %v1271_v60, -inf }
 0x815   : > { %1278 = vmax.xlane.f32.xlu0 %v1277_v62  ;;  %v1274_v63 = vpop.f32.mrb[26].mxu0 }
 0x816   : > { %v1729_v1 = vpop.f32.mrb[27].mxu0 }
 0x8a2   : > { %v1279_v2 = vpop.xlane.xlu0 %1278 }
 0x8a3   : > { %v1280_v3 = vsub.f32 %v1271_v60, %v1279_v2 }
 0x8a5   : > { %v1281_v4 = vmul.f32 1.442695, %v1280_v3 }
 0x8a7   : > { %1872 = vpow2.f32 %v1281_v4 }
 0x8b1   : > { %v1873_v5 = vpop.eup %1872 }
 0x8b2   : > { %v1283_v6 = vsel %vm752_vm3, %v1873_v5, 0.0 }
 0x8b3   : > { %1284 = vadd.xlane.f32.xlu1 %v1283_v6 }
 0x8c4   : > { %1289 = vrot.lane.b32.xlu1 %v2566_v54, %s2158_s21  ;;  %s2056_s21 = scalar_lea.vmem %s2055_s9, 256 }
 0x8c5   : > { %p2058_p6 = scmp.lt.s32.totalorder %s2056_s21, %s2050_s26 }
 0x8c7   : > { %p2059_p0 = por %p2058_p6, %p2057_p13 }
 0x8c9   : > { %p2060_p12 = pnand %p2059_p0, %p2053_p1 }
 0x8e1   : > { %v1220_v8 = vpop.f32.mrb[20].mxu1 }
 0x8e2   : > { %v1226_v9 = vadd.f32 %v1220_v8, %v2605_v33  ;;  %v1722_v10 = vpop.f32.mrb[21].mxu1 }
 0x8e3   : > { %v1223_v11 = vpop.f32.mrb[22].mxu1 }
 0x8e4   : > { %v1723_v12 = vpop.f32.mrb[23].mxu1 }
 0x940   : > { %v1285_v13 = vpop.xlane.xlu1 %1284 }
 0x941   : > { %1874 = vrcp.f32 %v1285_v13 }
 0x944   : > { %v1290_v14 = vpop.permute.xlu1 %1289 }
 0x945   : > { %v1295_v54 = vsel %vm814_vm4, %v1290_v14, 0 }
 0x946   : > { %1731 = vmatpush3.bf16.msra.mxu1 %v1295_v54 }
 0x94b   : > { %v1875_v15 = vpop.eup %1874 }
 0x94c   : > { %v1287_v16 = vmul.f32 %v1875_v15, %v1873_v5 }
 0x94e   : > { %v1288_v17 = vpack.c.bf16 %v1287_v16, %v1287_v16 }
 0x950   : > { %1733 = vmatmul.mubr.msk.bf16.vlgmr.msra.gmra.mrb[24].mxu1 %vm752_vm3, %v1288_v17 }
 0xa23   : > { %v1331_v18 = vpop.f32.mrb[24].mxu1 }
 0xa24   : > { %v1337_v19 = vpack.c.bf16 %v1331_v18, %v1331_v18  ;;  %v1734_v20 = vpop.f32.mrb[25].mxu1 }
 0xa25   : > { %v1334_v21 = vpop.f32.mrb[26].mxu1 }
 0xa26   : > { %v1735_v22 = vpop.f32.mrb[27].mxu1  ;;  %1739 = vmatmul.mubr.msk.bf16.vlgmr.msra.gmra.mrb[28].mxu0 %vm752_vm3, %v1337_v19 }
 0xaf9   : > { %v1378_v23 = vpop.f32.mrb[28].mxu0 }
 0xafa   : > { %v1384_v27 = vadd.f32 %v1378_v23, %v1226_v9  ;;  %v1740_v28 = vpop.f32.mrb[29].mxu0 }
 0xafb   : > { %v1381_v29 = vpop.f32.mrb[30].mxu0 }
 0xafc   : > { %v1392_v30 = vadd.f32 %v1608_v25, %v1384_v27  ;;  %v1741_v31 = vpop.f32.mrb[31].mxu0 }
 0xafe   : > { %1393 = vst.msk [vmem:[%s531_s17] sm:$0xff] %vm561_vm1, %v1392_v30 }
 0xaff   : > { %2063 = shalt.err (!%p2060_p12)
}
 0xb00   : > { %s2064_s3 = scalar_lea.hbm %s2649_s22, 128  ;;  %s2068_s14 = scalar_lea.hbm %s2782_s10, 256 }
 0xb01   : > { %p2065_p8 = scmp.ne.s32.totalorder %s2649_s22, %s2064_s3  ;;  %p2069_p5 = scmp.lt.u32.totalorder %s2649_s22, %s2782_s10 }
 0xb02   : > { %p2070_p9 = scmp.lt.u32.totalorder %s2068_s14, %s2064_s3  ;;  %p2072_p4 = scmp.lt.u32.totalorder %s2064_s3, %s2649_s22 }
 0xb03   : > { %p2066_p11 = pnand %p2065_p8, %p2783_p7 }
 0xb04   : > { %p2071_p2 = por %p2070_p9, %p2069_p5 }
 0xb05   : > { %p2067_p10 = pneg %p2066_p11 }
 0xb06   : > { %p2073_p3 = por %p2072_p4, %p2071_p2 }
 0xb08   : > { %p2074_p1 = pnand %p2073_p3, %p2067_p10 }
 0xb0a   : > { %2077 = shalt.err (!%p2074_p1)
}
 0xb0b   : > { %1760 = dma.vmem_to_hbm [thread:$0]  (%p2783_p7), %s2651_s11, 128, %s2649_s22, %s1395_s29  }
 0xb0c PF: > { %s2784_s25 = sld [smem:[#allocation21_spill]]  ;;  %s2785_s13 = sld [smem:[#allocation25_spill]] }
 0xb0d   : > { %s2786_s23 = sld [smem:[#allocation24_spill]] }
 0xb12   : > { %s1421_s30 = sand.u32 1, %s2784_s25   ;;  %p2787_p13 = scmp.ne.s32.totalorder %s2785_s13, 0 }
 0xb13   : > { %p2788_p6 = scmp.ge.s32.totalorder %s2786_s23, 2  ;;  %s1422_s16 = scalar_lea.sflag [#allocation6], %s1421_s30 }
 0xb15   : > { %p1783_p0 = pnand %p2788_p6, %p2787_p13 }
 0xb17   : > { %2119 = dma.done.wait (!%p1783_p0), %s1422_s16, 128  }
 0xb18   : > { %2121 = vsyncadd (!%p1783_p0), %s1422_s16, 4294967168  ;;  %s32_s22 = sadd.s32 1, %s2786_s23   ;;  %s2789_s12 = sld [smem:[#allocation28_spill]] }
 0xb19   : > { %p29_p12 = scmp.ge.s32.totalorder %s32_s22, 4   ;;  %s2790_s20 = sld [smem:[#allocation23_spill]] }
 0xb1a   : > { %s2791_s21 = sld [smem:[#allocation26_spill]]  ;;  %s2792_s17 = smov %s2128_s18 }
 0xb1b   : > { %s2793_s18 = smov %s2132_s19  ;;  %31 = sbr.rel (!%p29_p12) target bundleno = 18 (0x12), region = 149 }
 0xb1e   : > { %s2794_s19 = smov %s2789_s12 }
 0xb22   :  { %1427 = vsyncpa [#allocation5], 1 }
 0xb23   :  { %1429 = vsyncpa [#allocation5 + $0x1], 1 }
 0xb24   :  { %1430 = vsyncpa [#allocation8], 1 }
 0xb25   :  { %1432 = vsyncpa [#allocation8 + $0x1], 1 }
 0xb26   :  { %1433 = vsyncpa [#allocation11], 1 }
 0xb27   :  { %1434 = vsyncpa [#allocation14], 1 }
 0xb28   :  { %1435 = vsyncpa [#allocation6], 1 }
 0xb29   :  { %1437 = vsyncpa [#allocation6 + $0x1], 1 }

</bundles_post_ra>
